<compile_context>
chip_gen: v7x
topology: tpu7x:2x2x1
jax: 0.10.0
libtpu: 0.0.40
codegen_flags: <defaults>
</compile_context>

<pallas_src>
import functools
import math
import re

import jax
import jax.numpy as jnp
from jax.experimental import pallas as pl
from jax.experimental.pallas import tpu as pltpu


def _round_up(x, m):
    return ((x + m - 1) // m) * m


def _tpu_generation():
    """Best-effort TPU generation (5, 6, 7, ...); 0 if unknown."""
    try:
        kind = jax.devices()[0].device_kind  # e.g. "TPU v5 lite", "TPU v6e", "TPU7x"
        m = re.search(r"(\d+)", kind)
        return int(m.group(1)) if m else 0
    except Exception:
        return 0


def _pick_tile_m(n_rows, requested, num_cores):
    """Row tile: MXU/sublane aligned, shrunk for tiny inputs, and (on
    multi-TensorCore chips) capped so each core gets >=2 grid steps."""
    t = max(16, min(_round_up(requested, 16), _round_up(n_rows, 16)))
    if num_cores > 1:
        target_steps = 2 * num_cores               # >=2 steps per TensorCore
        if n_rows >= target_steps * 128:
            t = min(t, max(128, _round_up(pl.cdiv(n_rows, target_steps), 128)))
    return t


def _gating_kernel(x_ref, w1_ref, b1_ref, w2_ref, b2_ref, o_ref, *,
                   n_experts, tanh_in_bf16):
    # In-kernel f32 -> bf16 cast of the activation tile (VPU work hidden under
    # the DMA/MXU); avoids a separate XLA cast pass over x in HBM.
    x = x_ref[...].astype(jnp.bfloat16)
    # fc1: bf16 MXU matmul with f32 accumulation, bias add in f32.
    h = jnp.dot(x, w1_ref[...], preferred_element_type=jnp.float32) + b1_ref[...]
    if tanh_in_bf16:
        # v6e/v7x: bf16 EUP tanh (~2x throughput); result feeds the bf16 MXU
        # matmul directly, so accuracy stays within the bf16 tolerance anyway.
        h = jnp.tanh(h.astype(jnp.bfloat16))
    else:
        # v5e: no bf16 EUP -> tanh in f32, cast only for the MXU.
        h = jnp.tanh(h).astype(jnp.bfloat16)
    # fc2 on the lane-dense (padded-to-128) expert axis.
    logits = jnp.dot(h, w2_ref[...],
                     preferred_element_type=jnp.float32) + b2_ref[...]
    # Softmax over experts in f32 (matches torch softmax(dtype=float32)).
    # Padded experts carry zero weight columns and a -1e30 bias, so they never
    # win the max and exp() underflows to exactly 0 for them.  NOTE: the -1e30
    # trick requires the bias add / logits to stay f32.
    m = jnp.max(logits, axis=-1, keepdims=True)
    e = jnp.exp(logits - m)
    s = jnp.sum(e, axis=-1, keepdims=True)
    inv = pl.reciprocal(s, approx=True)   # EUP vrcp (otherwise idle slot)
    inv = inv * (2.0 - s * inv)           # one Newton step -> ~f32 accuracy
    # Store only the real experts: narrow (tile_m, E) block, so the padded
    # 128-wide f32 logits never touch HBM.
    o_ref[...] = e[:, :n_experts] * inv


def dense_gating_network(x, w1, b1, w2, b2, *, tile_m=None):
    """x: [..., D]; w1: [D, D]; b1: [D]; w2: [D, E]; b2: [E] -> [..., E] f32.

    Weight matrices are (in_dim, out_dim), i.e. torch's fc.weight transposed.
    """
    *lead, D = x.shape
    E = w2.shape[1]
    N = math.prod(lead) if lead else 1
    E_pad = _round_up(E, 128)

    gen = _tpu_generation()
    num_cores = 2 if gen >= 7 else 1          # v7x: 2 TensorCores / chip
    use_bf16_tanh = gen >= 6                  # v5e (and unknown): keep f32 tanh
    if tile_m is None:
        # Large tiles amortize the ~0.35us/step overhead on single-TC
        # v5e/v6e; v7x prefers more (parallel) steps across its two cores.
        tile_m = 1024 if (D <= 512 and gen < 7) else 512
    tile_m = _pick_tile_m(N, tile_m, num_cores)

    # Flatten rows; no wrapper-side pad or cast of x (both happen in-kernel /
    # via Pallas partial-block handling).
    x2 = x.reshape(N, D)

    w1b = w1.astype(jnp.bfloat16)
    # Pad the expert axis for lane-dense compute: zero weight columns, -1e30
    # bias -> padded logits are -1e30 -> softmax weight exactly 0.
    w2b = jnp.pad(w2, ((0, 0), (0, E_pad - E))).astype(jnp.bfloat16)
    b1f = b1.astype(jnp.float32).reshape(1, D)
    b2f = jnp.pad(b2.astype(jnp.float32), (0, E_pad - E),
                  constant_values=-1e30).reshape(1, E_pad)

    grid = (pl.cdiv(N, tile_m),)

    # Advisory cost estimate so XLA can schedule surrounding ops around the
    # custom call.
    cost = pl.CostEstimate(
        flops=int(2 * N * D * (D + E_pad)),
        transcendentals=int(N * (D + E_pad)),
        bytes_accessed=int(N * D * x2.dtype.itemsize
                           + (D * D + D * E_pad) * 2
                           + (D + E_pad) * 4
                           + N * E * 4),
    )

    # Rough VMEM footprint (double-buffered x/out blocks + resident weights +
    # f32 temporaries); only raise vmem_limit_bytes when actually needed.
    vmem_est = (2 * tile_m * D * x2.dtype.itemsize
                + 2 * ((D * D + D * E_pad) * 2 + (D + E_pad) * 4)
                + 2 * tile_m * E * 4
                + 3 * tile_m * max(D, E_pad) * 4)
    cp_kwargs = dict(dimension_semantics=("parallel",))
    if vmem_est > (24 << 20):
        cap = (60 << 20) if gen >= 7 else (100 << 20)
        cp_kwargs["vmem_limit_bytes"] = int(min(int(vmem_est * 1.25), cap))

    kernel = functools.partial(_gating_kernel, n_experts=E,
                               tanh_in_bf16=use_bf16_tanh)

    out = pl.pallas_call(
        kernel,
        out_shape=jax.ShapeDtypeStruct((N, E), jnp.float32),
        grid_spec=pltpu.PrefetchScalarGridSpec(
            num_scalar_prefetch=0,
            grid=grid,
            in_specs=[
                pl.BlockSpec((tile_m, D), lambda i: (i, 0)),   # x row tile (f32)
                pl.BlockSpec((D, D), lambda i: (0, 0)),        # W1 (resident)
                pl.BlockSpec((1, D), lambda i: (0, 0)),        # b1
                pl.BlockSpec((D, E_pad), lambda i: (0, 0)),    # W2 (lane-padded)
                pl.BlockSpec((1, E_pad), lambda i: (0, 0)),    # b2
            ],
            # Narrow (tile_m, E) output block: last block dim equals the full
            # array dim, so only the real experts are ever written to HBM.
            out_specs=pl.BlockSpec((tile_m, E), lambda i: (i, 0)),
        ),
        compiler_params=pltpu.CompilerParams(**cp_kwargs),
        cost_estimate=cost,
    )(x2, w1b, b1f, w2b, b2f)

    return out.reshape(*lead, E)


def reference_bf16(x, w1, b1, w2, b2, tanh_in_bf16=False):
    # Mimics the kernel's compute: bf16 matmuls, f32 accumulation,
    # bias/softmax in f32, tanh in the same dtype the kernel uses.
    h = jnp.dot(x.astype(jnp.bfloat16), w1.astype(jnp.bfloat16),
                preferred_element_type=jnp.float32) + b1
    if tanh_in_bf16:
        h = jnp.tanh(h.astype(jnp.bfloat16))
    else:
        h = jnp.tanh(h).astype(jnp.bfloat16)
    logits = jnp.dot(h, w2.astype(jnp.bfloat16),
                     preferred_element_type=jnp.float32) + b2
    return jax.nn.softmax(logits.astype(jnp.float32), axis=-1)


def reference_f32(x, w1, b1, w2, b2):
    h = jnp.tanh(x @ w1 + b1)
    logits = (h @ w2 + b2).astype(jnp.float32)
    return jax.nn.softmax(logits, axis=-1)


if __name__ == "__main__":
    # Small shapes: batch=2, seq=8, embed_dim=128, num_experts=8.
    batch, seq = 2, 8
    embed_dim, num_experts = 128, 8

    key = jax.random.PRNGKey(0)
    kx, k1w, k1b, k2w, k2b = jax.random.split(key, 5)

    x = jax.random.normal(kx, (batch, seq, embed_dim), dtype=jnp.float32)

    # PyTorch-Linear-style init: U(-1/sqrt(fan_in), 1/sqrt(fan_in)); weights
    # are stored pre-transposed as (in_dim, out_dim).
    bound = 1.0 / (embed_dim ** 0.5)
    w1 = jax.random.uniform(k1w, (embed_dim, embed_dim), jnp.float32, -bound, bound)
    b1 = jax.random.uniform(k1b, (embed_dim,), jnp.float32, -bound, bound)
    w2 = jax.random.uniform(k2w, (embed_dim, num_experts), jnp.float32, -bound, bound)
    b2 = jax.random.uniform(k2b, (num_experts,), jnp.float32, -bound, bound)

    p = dense_gating_network(x, w1, b1, w2, b2)
    p = jax.block_until_ready(p)

    assert p.shape == (batch, seq, num_experts)
    assert p.dtype == jnp.float32
    assert bool(jnp.all(jnp.isfinite(p)))
    assert jnp.allclose(jnp.sum(p, axis=-1), 1.0, atol=1e-5)

    x_flat = x.reshape(-1, embed_dim)
    p_ref = reference_bf16(x_flat, w1, b1, w2, b2,
                           tanh_in_bf16=_tpu_generation() >= 6).reshape(p.shape)
    assert jnp.allclose(p, p_ref, atol=3e-3, rtol=3e-3)

    p_f32 = reference_f32(x_flat, w1, b1, w2, b2).reshape(p.shape)
    assert jnp.allclose(p, p_f32, atol=2e-2)

    print("KERNEL_OK")
</pallas_src>

<mosaic_0001>
module attributes {stable_mosaic.version = 11 : i64} {
  func.func @_gating_kernel(%arg0: i32, %arg1: memref<16x128xf32, #tpu.memory_space<vmem>>, %arg2: memref<128x128xbf16, #tpu.memory_space<vmem>>, %arg3: memref<1x128xf32, #tpu.memory_space<vmem>>, %arg4: memref<128x128xbf16, #tpu.memory_space<vmem>>, %arg5: memref<1x128xf32, #tpu.memory_space<vmem>>, %arg6: memref<16x8xf32, #tpu.memory_space<vmem>>) attributes {dimension_semantics = [#tpu.dimension_semantics<parallel>], iteration_bounds = array<i64: 1>, scalar_prefetch = 0 : i64, scratch_operands = 0 : i64, tpu.core_type = #tpu.core_type<tc>, window_params = [{transform_indices = @transform_0, window_bounds = array<i64: 16, 128>}, {pipeline_mode = #tpu.pipeline_mode<synchronous>, transform_indices = @transform_1, window_bounds = array<i64: 128, 128>}, {pipeline_mode = #tpu.pipeline_mode<synchronous>, transform_indices = @transform_2, window_bounds = array<i64: 1, 128>}, {pipeline_mode = #tpu.pipeline_mode<synchronous>, transform_indices = @transform_3, window_bounds = array<i64: 128, 128>}, {pipeline_mode = #tpu.pipeline_mode<synchronous>, transform_indices = @transform_4, window_bounds = array<i64: 1, 128>}, {transform_indices = @transform_5, window_bounds = array<i64: 16, 8>}]} {
    %c0 = arith.constant 0 : index
    %c0_0 = arith.constant 0 : index
    %0 = vector.load %arg1[%c0, %c0_0] : memref<16x128xf32, #tpu.memory_space<vmem>>, vector<16x128xf32>
    %1 = arith.truncf %0 : vector<16x128xf32> to vector<16x128xbf16>
    %c0_1 = arith.constant 0 : index
    %c0_2 = arith.constant 0 : index
    %2 = vector.load %arg2[%c0_1, %c0_2] : memref<128x128xbf16, #tpu.memory_space<vmem>>, vector<128x128xbf16>
    %cst = arith.constant dense<0.000000e+00> : vector<16x128xf32>
    %3 = tpu.matmul %1, %2, %cst {dimension_numbers = #tpu.dot_dimension_numbers<[1], [0], [0], [1], [0, 0, 1, 1], [], []>} : vector<16x128xbf16>, vector<128x128xbf16>, vector<16x128xf32> -> vector<16x128xf32>
    %c0_3 = arith.constant 0 : index
    %c0_4 = arith.constant 0 : index
    %4 = vector.load %arg3[%c0_3, %c0_4] : memref<1x128xf32, #tpu.memory_space<vmem>>, vector<1x128xf32>
    %5 = vector.broadcast %4 : vector<1x128xf32> to vector<16x128xf32>
    %6 = arith.addf %3, %5 : vector<16x128xf32>
    %7 = math.tanh %6 : vector<16x128xf32>
    %8 = arith.truncf %7 : vector<16x128xf32> to vector<16x128xbf16>
    %c0_5 = arith.constant 0 : index
    %c0_6 = arith.constant 0 : index
    %9 = vector.load %arg4[%c0_5, %c0_6] : memref<128x128xbf16, #tpu.memory_space<vmem>>, vector<128x128xbf16>
    %cst_7 = arith.constant dense<0.000000e+00> : vector<16x128xf32>
    %10 = tpu.matmul %8, %9, %cst_7 {dimension_numbers = #tpu.dot_dimension_numbers<[1], [0], [0], [1], [0, 0, 1, 1], [], []>} : vector<16x128xbf16>, vector<128x128xbf16>, vector<16x128xf32> -> vector<16x128xf32>
    %c0_8 = arith.constant 0 : index
    %c0_9 = arith.constant 0 : index
    %11 = vector.load %arg5[%c0_8, %c0_9] : memref<1x128xf32, #tpu.memory_space<vmem>>, vector<1x128xf32>
    %12 = vector.broadcast %11 : vector<1x128xf32> to vector<16x128xf32>
    %13 = arith.addf %10, %12 : vector<16x128xf32>
    %cst_10 = arith.constant dense<0xFF800000> : vector<16xf32>
    %14 = vector.multi_reduction <maximumf>, %13, %cst_10 [1] : vector<16x128xf32> to vector<16xf32>
    %15 = vector.shape_cast %14 : vector<16xf32> to vector<16x1xf32>
    %16 = vector.broadcast %15 : vector<16x1xf32> to vector<16x128xf32>
    %17 = arith.subf %13, %16 : vector<16x128xf32>
    %18 = math.exp %17 : vector<16x128xf32>
    %cst_11 = arith.constant dense<0.000000e+00> : vector<16xf32>
    %19 = vector.multi_reduction <add>, %18, %cst_11 [1] : vector<16x128xf32> to vector<16xf32>
    %20 = vector.shape_cast %19 : vector<16xf32> to vector<16x1xf32>
    %21 = tpu.reciprocal %20 {approx = true} : vector<16x1xf32> -> vector<16x1xf32>
    %22 = arith.mulf %20, %21 : vector<16x1xf32>
    %cst_12 = arith.constant 2.000000e+00 : f32
    %23 = vector.broadcast %cst_12 : f32 to vector<16x1xf32>
    %24 = arith.subf %23, %22 : vector<16x1xf32>
    %25 = arith.mulf %21, %24 : vector<16x1xf32>
    %26 = vector.extract_strided_slice %18 {offsets = [0, 0], sizes = [16, 8], strides = [1, 1]} : vector<16x128xf32> to vector<16x8xf32>
    %27 = vector.broadcast %25 : vector<16x1xf32> to vector<16x8xf32>
    %28 = arith.mulf %26, %27 : vector<16x8xf32>
    %c0_13 = arith.constant 0 : index
    %c0_14 = arith.constant 0 : index
    %29 = vector.load %arg6[%c0_13, %c0_14] : memref<16x8xf32, #tpu.memory_space<vmem>>, vector<16x8xf32>
    tpu.vector_store %arg6[%c0_13, %c0_14], %28 {strides = array<i32>} : memref<16x8xf32, #tpu.memory_space<vmem>>, vector<16x8xf32>,
    return
  }
  func.func @transform_0(%arg0: i32) -> (i32, i32) {
    %c0_i32 = arith.constant 0 : i32
    %c0_i32_0 = arith.constant 0 : i32
    return %arg0, %c0_i32 : i32, i32
  }
  func.func @transform_1(%arg0: i32) -> (i32, i32) {
    %c0_i32 = arith.constant 0 : i32
    %c0_i32_0 = arith.constant 0 : i32
    %c0_i32_1 = arith.constant 0 : i32
    return %c0_i32, %c0_i32_0 : i32, i32
  }
  func.func @transform_2(%arg0: i32) -> (i32, i32) {
    %c0_i32 = arith.constant 0 : i32
    %c0_i32_0 = arith.constant 0 : i32
    %c0_i32_1 = arith.constant 0 : i32
    return %c0_i32, %c0_i32_0 : i32, i32
  }
  func.func @transform_3(%arg0: i32) -> (i32, i32) {
    %c0_i32 = arith.constant 0 : i32
    %c0_i32_0 = arith.constant 0 : i32
    %c0_i32_1 = arith.constant 0 : i32
    return %c0_i32, %c0_i32_0 : i32, i32
  }
  func.func @transform_4(%arg0: i32) -> (i32, i32) {
    %c0_i32 = arith.constant 0 : i32
    %c0_i32_0 = arith.constant 0 : i32
    %c0_i32_1 = arith.constant 0 : i32
    return %c0_i32, %c0_i32_0 : i32, i32
  }
  func.func @transform_5(%arg0: i32) -> (i32, i32) {
    %c0_i32 = arith.constant 0 : i32
    %c0_i32_0 = arith.constant 0 : i32
    return %arg0, %c0_i32 : i32, i32
  }
}

</mosaic_0001>

<bundles_post_ra>
// kernel: tpu_custom_call.1
= control target key start
LH: loop header
LB: loop body
LE: loop exit
PB: predicated region body
PF: predicated region fallthrough
CT: control target
= control target key end

     0   :  { %10 = vsyncpa [#allocation3], 0  ;;  %s601_s0 = inlined_call_operand.hbm [shape: f32[16,128], index: 0, kind: input, shape index: {}]   ;;  %s602_s1 = inlined_call_operand.hbm [shape: bf16[128,128], index: 1, kind: input, shape index: {}]   ;;  %s603_s2 = inlined_call_operand.vmem [shape: f32[1,128], index: 2, kind: input, shape index: {}]   ;;  %s604_s3 = inlined_call_operand.hbm [shape: bf16[128,128], index: 3, kind: input, shape index: {}]   ;;  %s605_s4 = inlined_call_operand.vmem [shape: f32[1,128], index: 4, kind: input, shape index: {}]   ;;  %s606_s5 = inlined_call_operand.vmem [shape: f32[16,8], index: 5, kind: output, shape index: {}]  }
   0x1   :  { %11 = vsyncpa [#allocation5], 0  ;;  %s508_s18 = smov [#allocation4]   ;;  %s438_s22 = scalar_lea.hbm %s602_s1, 1024 }
   0x2   :  { %s29_s19 = sshll.u32 %s508_s18, 4  ;;  %p439_p0 = scmp.ne.s32.totalorder %s602_s1, %s438_s22  ;;  %s30_s19 = int_to_ptr.vmem [resolvable:$true] %s29_s19 }
   0x3   :  { %p442_p1 = scmp.lt.u32.totalorder %s438_s22, %s602_s1 }
   0x5   :  { %p444_p2 = pnand %p442_p1, %p439_p0 }
   0x7   :  { %447 = shalt.err (!%p444_p2)
}
   0x8   :  { %s448_s27 = scalar_lea.vmem %s30_s19, 1024  ;;  %p453_p4 = scmp.lt.s32.totalorder %s30_s19, %s30_s19 }
   0x9   :  { %p449_p3 = scmp.ne.s32.totalorder %s30_s19, %s448_s27  ;;  %p454_p5 = scmp.lt.s32.totalorder %s448_s27, %s448_s27 }
   0xb   :  { %p455_p6 = por %p454_p5, %p453_p4 }
   0xd   :  { %p456_p7 = pnand %p455_p6, %p449_p3 }
   0xf   :  { %459 = shalt.err (!%p456_p7)
}
  0x10   :  { %s509_s28 = smov 64   ;;  %s510_s29 = smov 4  }
  0x11   :  { %35 = dma.hbm_to_vmem [thread:$0]  %s602_s1, 1024, %s30_s19, [#allocation5], %s509_s28, %s509_s28, %s510_s29  }
  0x12   :  { %s511_s7 = smov [#allocation2]   ;;  %s460_s11 = scalar_lea.hbm %s601_s0, 256 }
  0x13   :  { %s17_s8 = sshll.u32 %s511_s7, 4  ;;  %p461_p8 = scmp.ne.s32.totalorder %s601_s0, %s460_s11  ;;  %s18_s8 = int_to_ptr.vmem [resolvable:$true] %s17_s8 }
  0x14   :  { %p464_p9 = scmp.lt.u32.totalorder %s460_s11, %s601_s0 }
  0x16   :  { %p466_p10 = pnand %p464_p9, %p461_p8 }
  0x18   :  { %469 = shalt.err (!%p466_p10)
}
  0x19   :  { %s470_s16 = scalar_lea.vmem %s18_s8, 256  ;;  %p475_p12 = scmp.lt.s32.totalorder %s18_s8, %s18_s8 }
  0x1a   :  { %p471_p11 = scmp.ne.s32.totalorder %s18_s8, %s470_s16  ;;  %p476_p13 = scmp.lt.s32.totalorder %s470_s16, %s470_s16 }
  0x1c   :  { %p477_p0 = por %p476_p13, %p475_p12 }
  0x1e   :  { %p478_p1 = pnand %p477_p0, %p471_p11 }
  0x20   :  { %481 = shalt.err (!%p478_p1)
}
  0x21   :  { %s512_s1 = smov 128   ;;  %s513_s17 = smov 8  }
  0x22   :  { %23 = dma.hbm_to_vmem [thread:$0]  %s601_s0, 256, %s18_s8, [#allocation3], %s512_s1, %s512_s1, %s513_s17  }
  0x23   :  { %s514_s20 = smov [#allocation6]   ;;  %s482_s24 = scalar_lea.hbm %s604_s3, 1024 }
  0x24   :  { %s43_s21 = sshll.u32 %s514_s20, 4  ;;  %p483_p2 = scmp.ne.s32.totalorder %s604_s3, %s482_s24  ;;  %s44_s21 = int_to_ptr.vmem [resolvable:$true] %s43_s21 }
  0x25   :  { %p486_p3 = scmp.lt.u32.totalorder %s482_s24, %s604_s3 }
  0x27   :  { %p488_p4 = pnand %p486_p3, %p483_p2 }
  0x29   :  { %491 = shalt.err (!%p488_p4)
}
  0x2a   :  { %s492_s6 = scalar_lea.vmem %s44_s21, 1024  ;;  %p497_p6 = scmp.lt.s32.totalorder %s44_s21, %s44_s21 }
  0x2b   :  { %p493_p5 = scmp.ne.s32.totalorder %s44_s21, %s492_s6  ;;  %p498_p7 = scmp.lt.s32.totalorder %s492_s6, %s492_s6 }
  0x2d   :  { %p499_p8 = por %p498_p7, %p497_p6 }
  0x2f   :  { %p500_p9 = pnand %p499_p8, %p493_p5 }
  0x31   :  { %503 = shalt.err (!%p500_p9)
}
  0x32   :  { %49 = dma.hbm_to_vmem [thread:$0]  %s604_s3, 1024, %s44_s21, [#allocation5], %s509_s28, %s509_s28, %s510_s29  }
  0x33   :  { %504 = dma.done.wait [#allocation3], 256  }
  0x34   :  { %505 = vsyncadd [#allocation3], 4294967040 }
  0x35   :  { %506 = dma.done.wait [#allocation5], 2048  }
  0x36   :  { %507 = vsyncadd [#allocation5], 4294965248  ;;  %v515_v0 = vmov 0.0   ;;  %vm516_vm0 = vmmov 0   ;;  %v410_v1 = vld [vmem:[#allocation4] sm:$0xff]   ;;  %v411_v2 = vld [vmem:[#allocation4 + $0x8] sm:$0xff]  }
  0x37   :  { %361 = vmatprep.subr.bf16.mxu0 %v515_v0  ;;  %377 = vmatprep.mubr.msk.bf16.mxu0 %vm516_vm0, %v515_v0  ;;  %v412_v3 = vld [vmem:[#allocation4 + $0x10] sm:$0xff]   ;;  %v418_v4 = vld [vmem:[#allocation6] sm:$0xff]   ;;  %v413_v5 = vld [vmem:[#allocation4 + $0x18] sm:$0xff]   ;;  %vm316_vm1 = vcmask 64512  }
  0x38   :  { %381 = vmatprep.subr.bf16.mxu1 %v515_v0  ;;  %397 = vmatprep.mubr.msk.bf16.mxu1 %vm516_vm0, %v515_v0  ;;  %v419_v6 = vld [vmem:[#allocation6 + $0x8] sm:$0xff]   ;;  %v414_v7 = vld [vmem:[#allocation4 + $0x20] sm:$0xff]   ;;  %v420_v8 = vld [vmem:[#allocation6 + $0x10] sm:$0xff]  }
  0x39   :  { %362 = vmatpush3.bf16.msra.mxu0 %v410_v1  ;;  %382 = vmatpush3.bf16.msra.mxu1 %v418_v4  ;;  %v415_v9 = vld [vmem:[#allocation4 + $0x28] sm:$0xff]   ;;  %v421_v10 = vld [vmem:[#allocation6 + $0x18] sm:$0xff]   ;;  %v416_v11 = vld [vmem:[#allocation4 + $0x30] sm:$0xff]  }
  0x3a   :  { %363 = vmatprep.subr.bf16.mxu0 %v515_v0  ;;  %383 = vmatprep.subr.bf16.mxu1 %v515_v0  ;;  %v417_v12 = vld [vmem:[#allocation4 + $0x38] sm:$0xff]   ;;  %v62_v13 = vld [vmem:[#allocation2] sm:$0xff]  ;;  %v422_v16 = vld [vmem:[#allocation6 + $0x20] sm:$0xff]  }
  0x3b   :  { %v63_v14 = vld [vmem:[#allocation2 + $0x8] sm:$0xff]  ;;  %v423_v17 = vld [vmem:[#allocation6 + $0x28] sm:$0xff]   ;;  %v424_v18 = vld [vmem:[#allocation6 + $0x30] sm:$0xff]  }
  0x3c   :  { %v64_v15 = vpack.c.bf16 %v63_v14, %v62_v13  ;;  %v425_v19 = vld [vmem:[#allocation6 + $0x38] sm:$0xff]   ;;  %v325_v20 = vld [vmem:[%s603_s2] ss:$0 sm:$0xff] }
  0x3d   :  { %364 = vmatpush3.bf16.msra.mxu0 %v411_v2  ;;  %384 = vmatpush3.bf16.msra.mxu1 %v419_v6  ;;  %v334_v30 = vld [vmem:[%s605_s4] ss:$0 sm:$0xff] }
  0x3e   :  { %365 = vmatprep.subr.bf16.mxu0 %v515_v0  ;;  %385 = vmatprep.subr.bf16.mxu1 %v515_v0 }
  0x41   :  { %366 = vmatpush3.bf16.msra.mxu0 %v412_v3  ;;  %386 = vmatpush3.bf16.msra.mxu1 %v420_v8 }
  0x42   :  { %367 = vmatprep.subr.bf16.mxu0 %v515_v0  ;;  %387 = vmatprep.subr.bf16.mxu1 %v515_v0 }
  0x45   :  { %368 = vmatpush3.bf16.msra.mxu0 %v413_v5  ;;  %388 = vmatpush3.bf16.msra.mxu1 %v421_v10 }
  0x46   :  { %369 = vmatprep.subr.bf16.mxu0 %v515_v0  ;;  %389 = vmatprep.subr.bf16.mxu1 %v515_v0 }
  0x49   :  { %370 = vmatpush3.bf16.msra.mxu0 %v414_v7  ;;  %390 = vmatpush3.bf16.msra.mxu1 %v422_v16 }
  0x4a   :  { %371 = vmatprep.subr.bf16.mxu0 %v515_v0  ;;  %391 = vmatprep.subr.bf16.mxu1 %v515_v0 }
  0x4d   :  { %372 = vmatpush3.bf16.msra.mxu0 %v415_v9  ;;  %392 = vmatpush3.bf16.msra.mxu1 %v423_v17 }
  0x4e   :  { %373 = vmatprep.subr.bf16.mxu0 %v515_v0  ;;  %393 = vmatprep.subr.bf16.mxu1 %v515_v0 }
  0x51   :  { %374 = vmatpush3.bf16.msra.mxu0 %v416_v11  ;;  %394 = vmatpush3.bf16.msra.mxu1 %v424_v18 }
  0x52   :  { %375 = vmatprep.subr.bf16.mxu0 %v515_v0  ;;  %395 = vmatprep.subr.bf16.mxu1 %v515_v0 }
  0x55   :  { %376 = vmatpush3.bf16.msra.mxu0 %v417_v12  ;;  %396 = vmatpush3.bf16.msra.mxu1 %v425_v19 }
  0x58   :  { %378 = vmatmul.mubr.bf16.vlgmr.msra.gmra.mrb[0].mxu0 %v64_v15 }
 0x12b   :  { %v170_v21 = vpop.f32.mrb[0].mxu0 }
 0x12c   :  { %v171_v22 = vadd.f32 %v325_v20, %v170_v21  ;;  %v379_v23 = vpop.f32.mrb[1].mxu0 }
 0x12d   :  { %v173_v24 = vpop.f32.mrb[2].mxu0 }
 0x12e   :  { %v174_v25 = vadd.f32 %v325_v20, %v173_v24  ;;  %v380_v26 = vpop.f32.mrb[3].mxu0  ;;  %426 = vtanh.f32 %v171_v22 }
 0x130   :  { %428 = vtanh.f32 %v174_v25 }
 0x138   :  { %v427_v27 = vpop.eup %426 }
 0x13a   :  { %v429_v28 = vpop.eup %428 }
 0x13b   :  { %v179_v29 = vpack.c.bf16 %v429_v28, %v427_v27 }
 0x13d   :  { %398 = vmatmul.mubr.bf16.vlgmr.msra.gmra.mrb[0].mxu1 %v179_v29 }
 0x210   :  { %v285_v31 = vpop.f32.mrb[0].mxu1 }
 0x211   :  { %v286_v32 = vadd.f32 %v334_v30, %v285_v31  ;;  %v399_v33 = vpop.f32.mrb[1].mxu1 }
 0x212   :  { %v288_v34 = vpop.f32.mrb[2].mxu1 }
 0x213   :  { %292 = vmax.xlane.f32.xlu0 %v286_v32  ;;  %v400_v35 = vpop.f32.mrb[3].mxu1  ;;  %v289_v36 = vadd.f32 %v334_v30, %v288_v34 }
 0x217   :  { %294 = vmax.xlane.f32.xlu0 %v289_v36 }
 0x2a0   :  { %v293_v37 = vpop.xlane.xlu0 %292 }
 0x2a1   :  { %v296_v38 = vsub.f32 %v286_v32, %v293_v37 }
 0x2a3   :  { %v298_v39 = vmul.f32 1.442695, %v296_v38 }
 0x2a4   :  { %v295_v40 = vpop.xlane.xlu0 %294 }
 0x2a5   :  { %430 = vpow2.f32 %v298_v39  ;;  %v297_v41 = vsub.f32 %v289_v36, %v295_v40 }
 0x2a7   :  { %v300_v42 = vmul.f32 1.442695, %v297_v41 }
 0x2a9   :  { %432 = vpow2.f32 %v300_v42 }
 0x2af   :  { %v431_v43 = vpop.eup %430 }
 0x2b0   :  { %302 = vadd.xlane.f32.xlu1 %v431_v43 }
 0x2b3   :  { %v433_v44 = vpop.eup %432 }
 0x2b4   :  { %304 = vadd.xlane.f32.xlu1 %v433_v44 }
 0x33d   :  { %v303_v45 = vpop.xlane.xlu1 %302 }
 0x33e   :  { %434 = vrcp.f32 %v303_v45 }
 0x341   :  { %v305_v46 = vpop.xlane.xlu1 %304 }
 0x342   :  { %436 = vrcp.f32 %v305_v46 }
 0x348   :  { %v435_v47 = vpop.eup %434 }
 0x349   :  { %v308_v48 = vmul.f32 %v435_v47, %v303_v45 }
 0x34b   :  { %v310_v49 = vsub.f32 2.0, %v308_v48 }
 0x34c   :  { %v437_v50 = vpop.eup %436 }
 0x34d   :  { %v312_v51 = vmul.f32 %v435_v47, %v310_v49  ;;  %v309_v52 = vmul.f32 %v437_v50, %v305_v46 }
 0x34f   :  { %v314_v53 = vmul.f32 %v431_v43, %v312_v51  ;;  %v311_v54 = vsub.f32 2.0, %v309_v52 }
 0x351   :  { %317 = vst.msk [vmem:[%s606_s5] sm:$0xff] %vm316_vm1, %v314_v53  ;;  %v313_v55 = vmul.f32 %v437_v50, %v311_v54 }
 0x353   :  { %v315_v56 = vmul.f32 %v433_v44, %v313_v55 }
 0x355   :  { %318 = vst.msk [vmem:[%s606_s5 + $0x8] sm:$0xff] %vm316_vm1, %v315_v56 }
 0x356   :  { %323 = vsyncpa [#allocation3], 1 }
 0x357   :  { %324 = vsyncpa [#allocation5], 1 }

</bundles_post_ra>
